<compile_context>
chip_gen: v6e
topology: v6e:2x2x1
jax: 0.10.0
libtpu: 0.0.40
codegen_flags: <defaults>
</compile_context>

<pallas_src>
from functools import partial

import jax
import jax.numpy as jnp
from jax import lax
from jax.experimental import pallas as pl
from jax.experimental.pallas import tpu as pltpu


def transformer_layer_kernel(x_ref, wq_ref, bq_ref, wk_ref, bk_ref,
                             wv_ref, bv_ref, ow_ref, ob_ref,
                             fc1_ref, fc2_ref, o_ref, *, num_heads, tq):
    f32 = jnp.float32
    bf16 = jnp.bfloat16

    xs = x_ref[0]                                   # (S, C) f32, full sequence
    S, C = xs.shape
    Dh = C // num_heads

    if tq == S:                                     # single query tile
        xq32 = xs
    else:
        row0 = pl.multiple_of(pl.program_id(1) * tq, tq)
        xq32 = xs[pl.ds(row0, tq), :]               # (tq, C) query rows

    xs_b = xs.astype(bf16)
    xq_b = xq32.astype(bf16)

    # Fused projections: weights already combine q/k/v Linear with in_proj;
    # the softmax scale and in_proj bias slice are folded into wq/bq.
    q = jnp.dot(xq_b, wq_ref[...], preferred_element_type=f32) + bq_ref[...]  # (tq, C)
    k = jnp.dot(xs_b, wk_ref[...], preferred_element_type=f32) + bk_ref[...]  # (S, C)
    v = jnp.dot(xs_b, wv_ref[...], preferred_element_type=f32) + bv_ref[...]  # (S, C)

    # Per-head attention (static, small head count here).
    # TODO(synk): for large num_heads / seq, promote heads to an "arbitrary"
    # grid axis (or fori_loop with online softmax) to bound vreg live ranges
    # and avoid keeping the full (tq, S) score tile resident.
    heads = []
    for h in range(num_heads):
        sl = slice(h * Dh, (h + 1) * Dh)
        qh = q[:, sl].astype(bf16)                  # (tq, Dh)  (scale pre-folded)
        kh = k[:, sl].astype(bf16)                  # (S, Dh)
        vh = v[:, sl].astype(bf16)                  # (S, Dh)
        # Scores without materializing kh.T: contract last dims directly on MXU.
        s = lax.dot_general(qh, kh, (((1,), (1,)), ((), ())),
                            preferred_element_type=f32)        # (tq, S) f32
        m = jnp.max(s, axis=-1, keepdims=True)
        p = jnp.exp(s - m)
        denom = jnp.sum(p, axis=-1, keepdims=True)
        p = p * pl.reciprocal(denom, approx=True)               # EUP slot
        heads.append(jnp.dot(p.astype(bf16), vh, preferred_element_type=f32))

    # One full-width output projection (K = C) instead of H small K=Dh matmuls.
    a = jnp.concatenate(heads, axis=-1)                          # (tq, C) f32
    attn = jnp.dot(a.astype(bf16), ow_ref[...],
                   preferred_element_type=f32) + ob_ref[...]

    # Residual 1
    x1 = attn + xq32
    # Feed-forward: fc2(fc1(x)) + x   (both bias=False)
    h1 = jnp.dot(x1.astype(bf16), fc1_ref[...], preferred_element_type=f32)
    x2 = jnp.dot(h1.astype(bf16), fc2_ref[...], preferred_element_type=f32) + x1

    o_ref[0] = x2.astype(o_ref.dtype)


def transformer_layer(x_sbc, params, num_heads):
    """x_sbc: (S, B, C) float32, matching nn.MultiheadAttention default layout."""
    S, B, C = x_sbc.shape
    assert C % num_heads == 0
    Dh = C // num_heads
    scale = 1.0 / (Dh ** 0.5)

    x = jnp.transpose(x_sbc, (1, 0, 2))             # (B, S, C)

    f32 = jnp.float32
    bf16 = jnp.bfloat16

    in_w = params["in_w"]                           # (3C, C) in_proj_weight
    in_b = params["in_b"]                           # (3C,)   in_proj_bias
    wq_in, wk_in, wv_in = in_w[:C], in_w[C:2 * C], in_w[2 * C:]
    bq_in, bk_in, bv_in = in_b[:C], in_b[C:2 * C], in_b[2 * C:]

    # Fuse outer q/k/v Linear (bias=False) with the MHA in_proj (done once,
    # in f32, on the host side); fold softmax scale into the q path.
    wqT = (params["q_w"].T @ wq_in.T * scale).astype(bf16)       # (C, C)
    wkT = (params["k_w"].T @ wk_in.T).astype(bf16)               # (C, C)
    wvT = (params["v_w"].T @ wv_in.T).astype(bf16)               # (C, C)
    bq = (bq_in * scale).reshape(1, C).astype(f32)
    bk = bk_in.reshape(1, C).astype(f32)
    bv = bv_in.reshape(1, C).astype(f32)

    outwT = params["out_w"].T.astype(bf16)                       # (C, C)
    outb = params["out_b"].reshape(1, C).astype(f32)
    fc1T = params["fc1_w"].T.astype(bf16)                        # (C, C)
    fc2T = params["fc2_w"].T.astype(bf16)                        # (C, C)

    # Query-tile the sequence so both TensorCores (v7x) get work even for
    # small B; K/V stay full-length per tile.
    tq = 128 if S % 128 == 0 else S
    n_qt = S // tq

    kernel = partial(transformer_layer_kernel, num_heads=num_heads, tq=tq)

    # Weights are grid-invariant (index_map constant); for very large C one
    # could additionally single-buffer them (pipeline_mode) to save VMEM.
    def wspec(shape):
        return pl.BlockSpec(shape, lambda b, qi: (0, 0))

    out = pl.pallas_call(
        kernel,
        out_shape=jax.ShapeDtypeStruct((B, S, C), x.dtype),
        grid=(B, n_qt),
        in_specs=[
            pl.BlockSpec((1, S, C), lambda b, qi: (b, 0, 0)),    # x (full seq)
            wspec((C, C)), wspec((1, C)),                        # fused Wq, bq
            wspec((C, C)), wspec((1, C)),                        # fused Wk, bk
            wspec((C, C)), wspec((1, C)),                        # fused Wv, bv
            wspec((C, C)), wspec((1, C)),                        # out_proj W^T, b
            wspec((C, C)), wspec((C, C)),                        # fc1^T, fc2^T
        ],
        out_specs=pl.BlockSpec((1, tq, C), lambda b, qi: (b, qi, 0)),
        compiler_params=pltpu.CompilerParams(
            dimension_semantics=("parallel", "parallel"),
            vmem_limit_bytes=48 * 1024 * 1024,
        ),
    )(x, wqT, bq, wkT, bk, wvT, bv, outwT, outb, fc1T, fc2T)

    return jnp.transpose(out, (1, 0, 2))            # back to (S, B, C)


def reference(x_sbc, p, num_heads):
    """Pure-JAX f32 reference replicating PyTorch semantics (for validation)."""
    S, B, C = x_sbc.shape
    Dh = C // num_heads
    xq = x_sbc @ p["q_w"].T
    xk = x_sbc @ p["k_w"].T
    xv = x_sbc @ p["v_w"].T
    wq, wk, wv = jnp.split(p["in_w"], 3, axis=0)
    bq, bk, bv = jnp.split(p["in_b"], 3)
    q = xq @ wq.T + bq
    k = xk @ wk.T + bk
    v = xv @ wv.T + bv

    def split_heads(t):
        return jnp.transpose(t.reshape(S, B, num_heads, Dh), (1, 2, 0, 3))  # (B,H,S,Dh)

    qh, kh, vh = map(split_heads, (q, k, v))
    s = jnp.einsum("bhqd,bhkd->bhqk", qh * (1.0 / (Dh ** 0.5)), kh)
    attn_w = jax.nn.softmax(s, axis=-1)
    a = jnp.einsum("bhqk,bhkd->bhqd", attn_w, vh)
    a = jnp.transpose(a, (2, 0, 1, 3)).reshape(S, B, C)
    attn = a @ p["out_w"].T + p["out_b"]
    x1 = attn + x_sbc
    x2 = (x1 @ p["fc1_w"].T) @ p["fc2_w"].T + x1
    return x2


def init_params(key, c):
    ks = jax.random.split(key, 8)
    n = lambda k, shape: (jax.random.normal(k, shape, jnp.float32) * 0.1)
    return {
        "q_w": n(ks[0], (c, c)),
        "k_w": n(ks[1], (c, c)),
        "v_w": n(ks[2], (c, c)),
        "in_w": n(ks[3], (3 * c, c)),
        "in_b": n(ks[4], (3 * c,)),
        "out_w": n(ks[5], (c, c)),
        "out_b": n(ks[6], (c,)),
        "fc1_w": n(ks[7], (c, c)),
        "fc2_w": n(jax.random.fold_in(key, 99), (c, c)),
    }


if __name__ == "__main__":
    S, B, C, H = 8, 2, 32, 4
    key = jax.random.PRNGKey(0)
    kx, kp = jax.random.split(key)
    x = jax.random.normal(kx, (S, B, C), jnp.float32)
    params = init_params(kp, C)

    out = transformer_layer(x, params, H)
    out = jax.block_until_ready(out)

    ref = reference(x, params, H)
    assert out.shape == (S, B, C)
    # bf16 MXU operands + approx reciprocal -> looser tolerance than pure f32.
    assert jnp.allclose(out, ref, atol=5e-2, rtol=5e-2), (
        float(jnp.max(jnp.abs(out - ref)))
    )
    print("KERNEL_OK")
</pallas_src>

<mosaic_0001>
module attributes {stable_mosaic.version = 11 : i64} {
  func.func @transformer_layer_kernel(%arg0: i32, %arg1: i32, %arg2: memref<1x8x32xf32, #tpu.memory_space<vmem>>, %arg3: memref<32x32xbf16, #tpu.memory_space<vmem>>, %arg4: memref<1x32xf32, #tpu.memory_space<vmem>>, %arg5: memref<32x32xbf16, #tpu.memory_space<vmem>>, %arg6: memref<1x32xf32, #tpu.memory_space<vmem>>, %arg7: memref<32x32xbf16, #tpu.memory_space<vmem>>, %arg8: memref<1x32xf32, #tpu.memory_space<vmem>>, %arg9: memref<32x32xbf16, #tpu.memory_space<vmem>>, %arg10: memref<1x32xf32, #tpu.memory_space<vmem>>, %arg11: memref<32x32xbf16, #tpu.memory_space<vmem>>, %arg12: memref<32x32xbf16, #tpu.memory_space<vmem>>, %arg13: memref<1x8x32xf32, #tpu.memory_space<vmem>>) attributes {dimension_semantics = [#tpu.dimension_semantics<parallel>, #tpu.dimension_semantics<parallel>], iteration_bounds = array<i64: 2, 1>, scalar_prefetch = 0 : i64, scratch_operands = 0 : i64, tpu.core_type = #tpu.core_type<tc>, window_params = [{transform_indices = @transform_0, window_bounds = array<i64: 1, 8, 32>}, {pipeline_mode = #tpu.pipeline_mode<synchronous>, transform_indices = @transform_1, window_bounds = array<i64: 32, 32>}, {pipeline_mode = #tpu.pipeline_mode<synchronous>, transform_indices = @transform_2, window_bounds = array<i64: 1, 32>}, {pipeline_mode = #tpu.pipeline_mode<synchronous>, transform_indices = @transform_3, window_bounds = array<i64: 32, 32>}, {pipeline_mode = #tpu.pipeline_mode<synchronous>, transform_indices = @transform_4, window_bounds = array<i64: 1, 32>}, {pipeline_mode = #tpu.pipeline_mode<synchronous>, transform_indices = @transform_5, window_bounds = array<i64: 32, 32>}, {pipeline_mode = #tpu.pipeline_mode<synchronous>, transform_indices = @transform_6, window_bounds = array<i64: 1, 32>}, {pipeline_mode = #tpu.pipeline_mode<synchronous>, transform_indices = @transform_7, window_bounds = array<i64: 32, 32>}, {pipeline_mode = #tpu.pipeline_mode<synchronous>, transform_indices = @transform_8, window_bounds = array<i64: 1, 32>}, {pipeline_mode = #tpu.pipeline_mode<synchronous>, transform_indices = @transform_9, window_bounds = array<i64: 32, 32>}, {pipeline_mode = #tpu.pipeline_mode<synchronous>, transform_indices = @transform_10, window_bounds = array<i64: 32, 32>}, {transform_indices = @transform_11, window_bounds = array<i64: 1, 8, 32>}]} {
    %c0 = arith.constant 0 : index
    %c0_0 = arith.constant 0 : index
    %c0_1 = arith.constant 0 : index
    %0 = vector.load %arg2[%c0, %c0_0, %c0_1] : memref<1x8x32xf32, #tpu.memory_space<vmem>>, vector<1x8x32xf32>
    %1 = vector.shape_cast %0 : vector<1x8x32xf32> to vector<8x32xf32>
    %2 = arith.truncf %1 : vector<8x32xf32> to vector<8x32xbf16>
    %3 = arith.truncf %1 : vector<8x32xf32> to vector<8x32xbf16>
    %c0_2 = arith.constant 0 : index
    %c0_3 = arith.constant 0 : index
    %4 = vector.load %arg3[%c0_2, %c0_3] : memref<32x32xbf16, #tpu.memory_space<vmem>>, vector<32x32xbf16>
    %cst = arith.constant dense<0.000000e+00> : vector<8x32xf32>
    %5 = tpu.matmul %3, %4, %cst {dimension_numbers = #tpu.dot_dimension_numbers<[1], [0], [0], [1], [0, 0, 1, 1], [], []>} : vector<8x32xbf16>, vector<32x32xbf16>, vector<8x32xf32> -> vector<8x32xf32>
    %c0_4 = arith.constant 0 : index
    %c0_5 = arith.constant 0 : index
    %6 = vector.load %arg4[%c0_4, %c0_5] : memref<1x32xf32, #tpu.memory_space<vmem>>, vector<1x32xf32>
    %7 = vector.broadcast %6 : vector<1x32xf32> to vector<8x32xf32>
    %8 = arith.addf %5, %7 : vector<8x32xf32>
    %c0_6 = arith.constant 0 : index
    %c0_7 = arith.constant 0 : index
    %9 = vector.load %arg5[%c0_6, %c0_7] : memref<32x32xbf16, #tpu.memory_space<vmem>>, vector<32x32xbf16>
    %cst_8 = arith.constant dense<0.000000e+00> : vector<8x32xf32>
    %10 = tpu.matmul %2, %9, %cst_8 {dimension_numbers = #tpu.dot_dimension_numbers<[1], [0], [0], [1], [0, 0, 1, 1], [], []>} : vector<8x32xbf16>, vector<32x32xbf16>, vector<8x32xf32> -> vector<8x32xf32>
    %c0_9 = arith.constant 0 : index
    %c0_10 = arith.constant 0 : index
    %11 = vector.load %arg6[%c0_9, %c0_10] : memref<1x32xf32, #tpu.memory_space<vmem>>, vector<1x32xf32>
    %12 = vector.broadcast %11 : vector<1x32xf32> to vector<8x32xf32>
    %13 = arith.addf %10, %12 : vector<8x32xf32>
    %c0_11 = arith.constant 0 : index
    %c0_12 = arith.constant 0 : index
    %14 = vector.load %arg7[%c0_11, %c0_12] : memref<32x32xbf16, #tpu.memory_space<vmem>>, vector<32x32xbf16>
    %cst_13 = arith.constant dense<0.000000e+00> : vector<8x32xf32>
    %15 = tpu.matmul %2, %14, %cst_13 {dimension_numbers = #tpu.dot_dimension_numbers<[1], [0], [0], [1], [0, 0, 1, 1], [], []>} : vector<8x32xbf16>, vector<32x32xbf16>, vector<8x32xf32> -> vector<8x32xf32>
    %c0_14 = arith.constant 0 : index
    %c0_15 = arith.constant 0 : index
    %16 = vector.load %arg8[%c0_14, %c0_15] : memref<1x32xf32, #tpu.memory_space<vmem>>, vector<1x32xf32>
    %17 = vector.broadcast %16 : vector<1x32xf32> to vector<8x32xf32>
    %18 = arith.addf %15, %17 : vector<8x32xf32>
    %19 = vector.extract_strided_slice %8 {offsets = [0, 0], sizes = [8, 8], strides = [1, 1]} : vector<8x32xf32> to vector<8x8xf32>
    %20 = arith.truncf %19 : vector<8x8xf32> to vector<8x8xbf16>
    %21 = vector.extract_strided_slice %13 {offsets = [0, 0], sizes = [8, 8], strides = [1, 1]} : vector<8x32xf32> to vector<8x8xf32>
    %22 = arith.truncf %21 : vector<8x8xf32> to vector<8x8xbf16>
    %23 = vector.extract_strided_slice %18 {offsets = [0, 0], sizes = [8, 8], strides = [1, 1]} : vector<8x32xf32> to vector<8x8xf32>
    %24 = arith.truncf %23 : vector<8x8xf32> to vector<8x8xbf16>
    %cst_16 = arith.constant dense<0.000000e+00> : vector<8x8xf32>
    %25 = tpu.matmul %20, %22, %cst_16 {dimension_numbers = #tpu.dot_dimension_numbers<[1], [1], [0], [0], [0, 0, 1, 0], [], []>} : vector<8x8xbf16>, vector<8x8xbf16>, vector<8x8xf32> -> vector<8x8xf32>
    %cst_17 = arith.constant dense<0xFF800000> : vector<8xf32>
    %26 = vector.multi_reduction <maximumf>, %25, %cst_17 [1] : vector<8x8xf32> to vector<8xf32>
    %27 = vector.shape_cast %26 : vector<8xf32> to vector<8x1xf32>
    %28 = vector.broadcast %27 : vector<8x1xf32> to vector<8x8xf32>
    %29 = arith.subf %25, %28 : vector<8x8xf32>
    %30 = math.exp %29 : vector<8x8xf32>
    %cst_18 = arith.constant dense<0.000000e+00> : vector<8xf32>
    %31 = vector.multi_reduction <add>, %30, %cst_18 [1] : vector<8x8xf32> to vector<8xf32>
    %32 = vector.shape_cast %31 : vector<8xf32> to vector<8x1xf32>
    %33 = tpu.reciprocal %32 {approx = true} : vector<8x1xf32> -> vector<8x1xf32>
    %34 = vector.broadcast %33 : vector<8x1xf32> to vector<8x8xf32>
    %35 = arith.mulf %30, %34 : vector<8x8xf32>
    %36 = arith.truncf %35 : vector<8x8xf32> to vector<8x8xbf16>
    %cst_19 = arith.constant dense<0.000000e+00> : vector<8x8xf32>
    %37 = tpu.matmul %36, %24, %cst_19 {dimension_numbers = #tpu.dot_dimension_numbers<[1], [0], [0], [1], [0, 0, 1, 1], [], []>} : vector<8x8xbf16>, vector<8x8xbf16>, vector<8x8xf32> -> vector<8x8xf32>
    %38 = vector.extract_strided_slice %8 {offsets = [0, 8], sizes = [8, 8], strides = [1, 1]} : vector<8x32xf32> to vector<8x8xf32>
    %39 = arith.truncf %38 : vector<8x8xf32> to vector<8x8xbf16>
    %40 = vector.extract_strided_slice %13 {offsets = [0, 8], sizes = [8, 8], strides = [1, 1]} : vector<8x32xf32> to vector<8x8xf32>
    %41 = arith.truncf %40 : vector<8x8xf32> to vector<8x8xbf16>
    %42 = vector.extract_strided_slice %18 {offsets = [0, 8], sizes = [8, 8], strides = [1, 1]} : vector<8x32xf32> to vector<8x8xf32>
    %43 = arith.truncf %42 : vector<8x8xf32> to vector<8x8xbf16>
    %cst_20 = arith.constant dense<0.000000e+00> : vector<8x8xf32>
    %44 = tpu.matmul %39, %41, %cst_20 {dimension_numbers = #tpu.dot_dimension_numbers<[1], [1], [0], [0], [0, 0, 1, 0], [], []>} : vector<8x8xbf16>, vector<8x8xbf16>, vector<8x8xf32> -> vector<8x8xf32>
    %cst_21 = arith.constant dense<0xFF800000> : vector<8xf32>
    %45 = vector.multi_reduction <maximumf>, %44, %cst_21 [1] : vector<8x8xf32> to vector<8xf32>
    %46 = vector.shape_cast %45 : vector<8xf32> to vector<8x1xf32>
    %47 = vector.broadcast %46 : vector<8x1xf32> to vector<8x8xf32>
    %48 = arith.subf %44, %47 : vector<8x8xf32>
    %49 = math.exp %48 : vector<8x8xf32>
    %cst_22 = arith.constant dense<0.000000e+00> : vector<8xf32>
    %50 = vector.multi_reduction <add>, %49, %cst_22 [1] : vector<8x8xf32> to vector<8xf32>
    %51 = vector.shape_cast %50 : vector<8xf32> to vector<8x1xf32>
    %52 = tpu.reciprocal %51 {approx = true} : vector<8x1xf32> -> vector<8x1xf32>
    %53 = vector.broadcast %52 : vector<8x1xf32> to vector<8x8xf32>
    %54 = arith.mulf %49, %53 : vector<8x8xf32>
    %55 = arith.truncf %54 : vector<8x8xf32> to vector<8x8xbf16>
    %cst_23 = arith.constant dense<0.000000e+00> : vector<8x8xf32>
    %56 = tpu.matmul %55, %43, %cst_23 {dimension_numbers = #tpu.dot_dimension_numbers<[1], [0], [0], [1], [0, 0, 1, 1], [], []>} : vector<8x8xbf16>, vector<8x8xbf16>, vector<8x8xf32> -> vector<8x8xf32>
    %57 = vector.extract_strided_slice %8 {offsets = [0, 16], sizes = [8, 8], strides = [1, 1]} : vector<8x32xf32> to vector<8x8xf32>
    %58 = arith.truncf %57 : vector<8x8xf32> to vector<8x8xbf16>
    %59 = vector.extract_strided_slice %13 {offsets = [0, 16], sizes = [8, 8], strides = [1, 1]} : vector<8x32xf32> to vector<8x8xf32>
    %60 = arith.truncf %59 : vector<8x8xf32> to vector<8x8xbf16>
    %61 = vector.extract_strided_slice %18 {offsets = [0, 16], sizes = [8, 8], strides = [1, 1]} : vector<8x32xf32> to vector<8x8xf32>
    %62 = arith.truncf %61 : vector<8x8xf32> to vector<8x8xbf16>
    %cst_24 = arith.constant dense<0.000000e+00> : vector<8x8xf32>
    %63 = tpu.matmul %58, %60, %cst_24 {dimension_numbers = #tpu.dot_dimension_numbers<[1], [1], [0], [0], [0, 0, 1, 0], [], []>} : vector<8x8xbf16>, vector<8x8xbf16>, vector<8x8xf32> -> vector<8x8xf32>
    %cst_25 = arith.constant dense<0xFF800000> : vector<8xf32>
    %64 = vector.multi_reduction <maximumf>, %63, %cst_25 [1] : vector<8x8xf32> to vector<8xf32>
    %65 = vector.shape_cast %64 : vector<8xf32> to vector<8x1xf32>
    %66 = vector.broadcast %65 : vector<8x1xf32> to vector<8x8xf32>
    %67 = arith.subf %63, %66 : vector<8x8xf32>
    %68 = math.exp %67 : vector<8x8xf32>
    %cst_26 = arith.constant dense<0.000000e+00> : vector<8xf32>
    %69 = vector.multi_reduction <add>, %68, %cst_26 [1] : vector<8x8xf32> to vector<8xf32>
    %70 = vector.shape_cast %69 : vector<8xf32> to vector<8x1xf32>
    %71 = tpu.reciprocal %70 {approx = true} : vector<8x1xf32> -> vector<8x1xf32>
    %72 = vector.broadcast %71 : vector<8x1xf32> to vector<8x8xf32>
    %73 = arith.mulf %68, %72 : vector<8x8xf32>
    %74 = arith.truncf %73 : vector<8x8xf32> to vector<8x8xbf16>
    %cst_27 = arith.constant dense<0.000000e+00> : vector<8x8xf32>
    %75 = tpu.matmul %74, %62, %cst_27 {dimension_numbers = #tpu.dot_dimension_numbers<[1], [0], [0], [1], [0, 0, 1, 1], [], []>} : vector<8x8xbf16>, vector<8x8xbf16>, vector<8x8xf32> -> vector<8x8xf32>
    %76 = vector.extract_strided_slice %8 {offsets = [0, 24], sizes = [8, 8], strides = [1, 1]} : vector<8x32xf32> to vector<8x8xf32>
    %77 = arith.truncf %76 : vector<8x8xf32> to vector<8x8xbf16>
    %78 = vector.extract_strided_slice %13 {offsets = [0, 24], sizes = [8, 8], strides = [1, 1]} : vector<8x32xf32> to vector<8x8xf32>
    %79 = arith.truncf %78 : vector<8x8xf32> to vector<8x8xbf16>
    %80 = vector.extract_strided_slice %18 {offsets = [0, 24], sizes = [8, 8], strides = [1, 1]} : vector<8x32xf32> to vector<8x8xf32>
    %81 = arith.truncf %80 : vector<8x8xf32> to vector<8x8xbf16>
    %cst_28 = arith.constant dense<0.000000e+00> : vector<8x8xf32>
    %82 = tpu.matmul %77, %79, %cst_28 {dimension_numbers = #tpu.dot_dimension_numbers<[1], [1], [0], [0], [0, 0, 1, 0], [], []>} : vector<8x8xbf16>, vector<8x8xbf16>, vector<8x8xf32> -> vector<8x8xf32>
    %cst_29 = arith.constant dense<0xFF800000> : vector<8xf32>
    %83 = vector.multi_reduction <maximumf>, %82, %cst_29 [1] : vector<8x8xf32> to vector<8xf32>
    %84 = vector.shape_cast %83 : vector<8xf32> to vector<8x1xf32>
    %85 = vector.broadcast %84 : vector<8x1xf32> to vector<8x8xf32>
    %86 = arith.subf %82, %85 : vector<8x8xf32>
    %87 = math.exp %86 : vector<8x8xf32>
    %cst_30 = arith.constant dense<0.000000e+00> : vector<8xf32>
    %88 = vector.multi_reduction <add>, %87, %cst_30 [1] : vector<8x8xf32> to vector<8xf32>
    %89 = vector.shape_cast %88 : vector<8xf32> to vector<8x1xf32>
    %90 = tpu.reciprocal %89 {approx = true} : vector<8x1xf32> -> vector<8x1xf32>
    %91 = vector.broadcast %90 : vector<8x1xf32> to vector<8x8xf32>
    %92 = arith.mulf %87, %91 : vector<8x8xf32>
    %93 = arith.truncf %92 : vector<8x8xf32> to vector<8x8xbf16>
    %cst_31 = arith.constant dense<0.000000e+00> : vector<8x8xf32>
    %94 = tpu.matmul %93, %81, %cst_31 {dimension_numbers = #tpu.dot_dimension_numbers<[1], [0], [0], [1], [0, 0, 1, 1], [], []>} : vector<8x8xbf16>, vector<8x8xbf16>, vector<8x8xf32> -> vector<8x8xf32>
    %95 = tpu.concatenate %37, %56, %75, %94 in 1 : vector<8x8xf32>, vector<8x8xf32>, vector<8x8xf32>, vector<8x8xf32> -> vector<8x32xf32>
    %96 = arith.truncf %95 : vector<8x32xf32> to vector<8x32xbf16>
    %c0_32 = arith.constant 0 : index
    %c0_33 = arith.constant 0 : index
    %97 = vector.load %arg9[%c0_32, %c0_33] : memref<32x32xbf16, #tpu.memory_space<vmem>>, vector<32x32xbf16>
    %cst_34 = arith.constant dense<0.000000e+00> : vector<8x32xf32>
    %98 = tpu.matmul %96, %97, %cst_34 {dimension_numbers = #tpu.dot_dimension_numbers<[1], [0], [0], [1], [0, 0, 1, 1], [], []>} : vector<8x32xbf16>, vector<32x32xbf16>, vector<8x32xf32> -> vector<8x32xf32>
    %c0_35 = arith.constant 0 : index
    %c0_36 = arith.constant 0 : index
    %99 = vector.load %arg10[%c0_35, %c0_36] : memref<1x32xf32, #tpu.memory_space<vmem>>, vector<1x32xf32>
    %100 = vector.broadcast %99 : vector<1x32xf32> to vector<8x32xf32>
    %101 = arith.addf %98, %100 : vector<8x32xf32>
    %102 = arith.addf %101, %1 : vector<8x32xf32>
    %103 = arith.truncf %102 : vector<8x32xf32> to vector<8x32xbf16>
    %c0_37 = arith.constant 0 : index
    %c0_38 = arith.constant 0 : index
    %104 = vector.load %arg11[%c0_37, %c0_38] : memref<32x32xbf16, #tpu.memory_space<vmem>>, vector<32x32xbf16>
    %cst_39 = arith.constant dense<0.000000e+00> : vector<8x32xf32>
    %105 = tpu.matmul %103, %104, %cst_39 {dimension_numbers = #tpu.dot_dimension_numbers<[1], [0], [0], [1], [0, 0, 1, 1], [], []>} : vector<8x32xbf16>, vector<32x32xbf16>, vector<8x32xf32> -> vector<8x32xf32>
    %106 = arith.truncf %105 : vector<8x32xf32> to vector<8x32xbf16>
    %c0_40 = arith.constant 0 : index
    %c0_41 = arith.constant 0 : index
    %107 = vector.load %arg12[%c0_40, %c0_41] : memref<32x32xbf16, #tpu.memory_space<vmem>>, vector<32x32xbf16>
    %cst_42 = arith.constant dense<0.000000e+00> : vector<8x32xf32>
    %108 = tpu.matmul %106, %107, %cst_42 {dimension_numbers = #tpu.dot_dimension_numbers<[1], [0], [0], [1], [0, 0, 1, 1], [], []>} : vector<8x32xbf16>, vector<32x32xbf16>, vector<8x32xf32> -> vector<8x32xf32>
    %109 = arith.addf %108, %102 : vector<8x32xf32>
    %c0_43 = arith.constant 0 : index
    %c0_44 = arith.constant 0 : index
    %c0_45 = arith.constant 0 : index
    %110 = vector.load %arg13[%c0_43, %c0_44, %c0_45] : memref<1x8x32xf32, #tpu.memory_space<vmem>>, vector<1x8x32xf32>
    %111 = vector.shape_cast %110 : vector<1x8x32xf32> to vector<8x32xf32>
    %112 = vector.shape_cast %109 : vector<8x32xf32> to vector<1x8x32xf32>
    tpu.vector_store %arg13[%c0_43, %c0_44, %c0_45], %112 {strides = array<i32>} : memref<1x8x32xf32, #tpu.memory_space<vmem>>, vector<1x8x32xf32>,
    return
  }
  func.func @transform_0(%arg0: i32, %arg1: i32) -> (i32, i32, i32) {
    %c0_i32 = arith.constant 0 : i32
    %c0_i32_0 = arith.constant 0 : i32
    %c0_i32_1 = arith.constant 0 : i32
    return %arg0, %c0_i32, %c0_i32_0 : i32, i32, i32
  }
  func.func @transform_1(%arg0: i32, %arg1: i32) -> (i32, i32) {
    %c0_i32 = arith.constant 0 : i32
    %c0_i32_0 = arith.constant 0 : i32
    %c0_i32_1 = arith.constant 0 : i32
    return %c0_i32, %c0_i32_0 : i32, i32
  }
  func.func @transform_2(%arg0: i32, %arg1: i32) -> (i32, i32) {
    %c0_i32 = arith.constant 0 : i32
    %c0_i32_0 = arith.constant 0 : i32
    %c0_i32_1 = arith.constant 0 : i32
    return %c0_i32, %c0_i32_0 : i32, i32
  }
  func.func @transform_3(%arg0: i32, %arg1: i32) -> (i32, i32) {
    %c0_i32 = arith.constant 0 : i32
    %c0_i32_0 = arith.constant 0 : i32
    %c0_i32_1 = arith.constant 0 : i32
    return %c0_i32, %c0_i32_0 : i32, i32
  }
  func.func @transform_4(%arg0: i32, %arg1: i32) -> (i32, i32) {
    %c0_i32 = arith.constant 0 : i32
    %c0_i32_0 = arith.constant 0 : i32
    %c0_i32_1 = arith.constant 0 : i32
    return %c0_i32, %c0_i32_0 : i32, i32
  }
  func.func @transform_5(%arg0: i32, %arg1: i32) -> (i32, i32) {
    %c0_i32 = arith.constant 0 : i32
    %c0_i32_0 = arith.constant 0 : i32
    %c0_i32_1 = arith.constant 0 : i32
    return %c0_i32, %c0_i32_0 : i32, i32
  }
  func.func @transform_6(%arg0: i32, %arg1: i32) -> (i32, i32) {
    %c0_i32 = arith.constant 0 : i32
    %c0_i32_0 = arith.constant 0 : i32
    %c0_i32_1 = arith.constant 0 : i32
    return %c0_i32, %c0_i32_0 : i32, i32
  }
  func.func @transform_7(%arg0: i32, %arg1: i32) -> (i32, i32) {
    %c0_i32 = arith.constant 0 : i32
    %c0_i32_0 = arith.constant 0 : i32
    %c0_i32_1 = arith.constant 0 : i32
    return %c0_i32, %c0_i32_0 : i32, i32
  }
  func.func @transform_8(%arg0: i32, %arg1: i32) -> (i32, i32) {
    %c0_i32 = arith.constant 0 : i32
    %c0_i32_0 = arith.constant 0 : i32
    %c0_i32_1 = arith.constant 0 : i32
    return %c0_i32, %c0_i32_0 : i32, i32
  }
  func.func @transform_9(%arg0: i32, %arg1: i32) -> (i32, i32) {
    %c0_i32 = arith.constant 0 : i32
    %c0_i32_0 = arith.constant 0 : i32
    %c0_i32_1 = arith.constant 0 : i32
    return %c0_i32, %c0_i32_0 : i32, i32
  }
  func.func @transform_10(%arg0: i32, %arg1: i32) -> (i32, i32) {
    %c0_i32 = arith.constant 0 : i32
    %c0_i32_0 = arith.constant 0 : i32
    %c0_i32_1 = arith.constant 0 : i32
    return %c0_i32, %c0_i32_0 : i32, i32
  }
  func.func @transform_11(%arg0: i32, %arg1: i32) -> (i32, i32, i32) {
    %c0_i32 = arith.constant 0 : i32
    %c0_i32_0 = arith.constant 0 : i32
    return %arg0, %arg1, %c0_i32 : i32, i32, i32
  }
}

</mosaic_0001>

<bundles_post_ra>
// kernel: tpu_custom_call.1
= control target key start
LH: loop header
LB: loop body
LE: loop exit
PB: predicated region body
PF: predicated region fallthrough
CT: control target
= control target key end

     0   :  { %s2764_s0 = inlined_call_operand.hbm [shape: f32[2,8,32], index: 0, kind: input, shape index: {}]   ;;  %s2765_s1 = inlined_call_operand.hbm [shape: bf16[32,32], index: 1, kind: input, shape index: {}]   ;;  %s2766_s2 = inlined_call_operand.hbm [shape: f32[1,32], index: 2, kind: input, shape index: {}]   ;;  %s2767_s3 = inlined_call_operand.hbm [shape: bf16[32,32], index: 3, kind: input, shape index: {}]   ;;  %s2768_s4 = inlined_call_operand.hbm [shape: f32[1,32], index: 4, kind: input, shape index: {}]   ;;  %s2769_s5 = inlined_call_operand.hbm [shape: bf16[32,32], index: 5, kind: input, shape index: {}]   ;;  %s2770_s6 = inlined_call_operand.hbm [shape: f32[1,32], index: 6, kind: input, shape index: {}]   ;;  %s2771_s7 = inlined_call_operand.hbm [shape: bf16[32,32], index: 7, kind: input, shape index: {}]   ;;  %s2772_s8 = inlined_call_operand.hbm [shape: f32[1,32], index: 8, kind: input, shape index: {}]   ;;  %s2773_s9 = inlined_call_operand.vmem [shape: bf16[32,32], index: 9, kind: input, shape index: {}]   ;;  %s2774_s10 = inlined_call_operand.hbm [shape: bf16[32,32], index: 10, kind: input, shape index: {}]   ;;  %s2775_s11 = inlined_call_operand.hbm [shape: f32[2,8,32], index: 11, kind: output, shape index: {}]  }
   0x1   :  { %2782 = sst [smem:[#allocation27_spill]] %s2765_s1 }
   0x2   :  { %2783 = sst [smem:[#allocation28_spill]] %s2766_s2 }
   0x3   :  { %2784 = sst [smem:[#allocation29_spill]] %s2767_s3 }
   0x4   :  { %2785 = sst [smem:[#allocation30_spill]] %s2768_s4 }
   0x5   :  { %2786 = sst [smem:[#allocation31_spill]] %s2769_s5 }
   0x6   :  { %2787 = sst [smem:[#allocation32_spill]] %s2770_s6 }
   0x7   :  { %2788 = sst [smem:[#allocation33_spill]] %s2771_s7 }
   0x8   :  { %2789 = sst [smem:[#allocation34_spill]] %s2775_s11 }
   0x9   :  { %16 = vsyncpa [#allocation3], 0 }
   0xa   :  { %18 = vsyncpa [#allocation3 + $0x1], 0 }
   0xb   :  { %19 = vsyncpa [#allocation6], 0 }
   0xc   :  { %20 = vsyncpa [#allocation9], 0 }
   0xd   :  { %21 = vsyncpa [#allocation12], 0 }
   0xe   :  { %22 = vsyncpa [#allocation15], 0 }
   0xf   :  { %23 = vsyncpa [#allocation18], 0 }
  0x10   :  { %24 = vsyncpa [#allocation4], 0 }
  0x11   :  { %26 = vsyncpa [#allocation4 + $0x1], 0  ;;  %s2390_s17 = smov 0   ;;  %s2392_s18 = smov 0  }
  0x12   :  { %s2394_s19 = smov 0   ;;  %s2396_s20 = smov 0  }
  0x13   :  { %s2398_s21 = smov 0   ;;  %s2400_s22 = smov 0  }
  0x14 LB: > { %s2776_s23 = sadd.s32 4294967295, %s2307_s22   ;;  %p1565_p0 = scmp.ge.s32.totalorder %s2307_s22, 1  ;;  %s2307_s22 = sphi %s2400_s22, %s32_s22   ;;  %s2303_s21 = sphi %s2398_s21, %s2817_s21   ;;  %s2299_s20 = sphi %s2396_s20, %s2816_s20   ;;  %s2295_s19 = sphi %s2394_s19, %s2815_s19   ;;  %s2291_s18 = sphi %s2392_s18, %s2814_s18   ;;  %s2287_s17 = sphi %s2390_s17, %s2813_s17  }
  0x15   : > { %p2424_p1 = scmp.eq.s32.totalorder %s2776_s23, 0  ;;  %p313_p2 = scmp.lt.s32.totalorder %s2307_s22, 3 }
  0x16   : > { %s2309_s26 = smov [#allocation5]   ;;  %s2310_s29 = smov [#allocation8]  }
  0x17   : > { %s2790_s24 = scalar_select %p2424_p1, 1, 0 }
  0x18   : > { %p2429_p3 = pnand %p1565_p0, %p313_p2  ;;  %s325_s27 = sshll.u32 %s2309_s26, 4  ;;  %s326_s27 = int_to_ptr.vmem [resolvable:$true] %s325_s27 }
  0x19   : > { %s349_s30 = sshll.u32 %s2310_s29, 4  ;;  %s2311_s12 = smov [#allocation11]   ;;  %s350_s30 = int_to_ptr.vmem [resolvable:$true] %s349_s30 }
  0x1a   : > { %s2791_s25 = scalar_select %p2429_p3, 1, 0 }
  0x1b   : > { %p1794_p4 = pneg %p2429_p3  ;;  %s373_s13 = sshll.u32 %s2311_s12, 4  ;;  %s374_s13 = int_to_ptr.vmem [resolvable:$true] %s373_s13 }
  0x1c   : > { %s1956_s15 = scalar_lea.vmem %s326_s27, 256  ;;  %p1964_p11 = scmp.lt.s32.totalorder %s326_s27, %s326_s27 }
  0x1d   : > { %p2438_p6 = pnand %p1794_p4, %p2424_p1  ;;  %p1957_p8 = scmp.ne.s32.totalorder %s326_s27, %s1956_s15 }
  0x1e   : > { %p1965_p12 = scmp.lt.s32.totalorder %s1956_s15, %s1956_s15 }
  0x1f   : > { %p2444_p7 = pneg %p2438_p6 }
  0x20   : > { %p1966_p13 = por %p1965_p12, %p1964_p11 }
  0x21   : > { %p1959_p9 = pnand %p1957_p8, %p2444_p7 }
  0x23   : > { %p1960_p10 = pneg %p1959_p9 }
  0x25   : > { %p1967_p0 = pnand %p1966_p13, %p1960_p10 }
  0x27   : > { %1970 = shalt.err (!%p1967_p0)
}
  0x28   : > { %s2778_s16 = smov 64   ;;  %s2313_s26 = smov 4  }
  0x29   : > { %s2794_s1 = sld [smem:[#allocation27_spill]]  ;;  %s1982_s23 = scalar_lea.vmem %s350_s30, 256 }
  0x2a   : > { %p1983_p2 = scmp.ne.s32.totalorder %s350_s30, %s1982_s23  ;;  %p1990_p9 = scmp.lt.s32.totalorder %s350_s30, %s350_s30 }
  0x2b   : > { %p1991_p10 = scmp.lt.s32.totalorder %s1982_s23, %s1982_s23 }
  0x2c   : > { %p1985_p4 = pnand %p1983_p2, %p2444_p7 }
  0x2d   : > { %p1992_p11 = por %p1991_p10, %p1990_p9 }
  0x2e   : > { %p1986_p8 = pneg %p1985_p4 }
  0x2f   : > { %1797 = dma.hbm_to_vmem [thread:$0]  (!%p2438_p6), %s2794_s1, 256, %s326_s27, [#allocation6], %s2778_s16, %s2778_s16, %s2313_s26  }
  0x30   : > { %p1993_p12 = pnand %p1992_p11, %p1986_p8 }
  0x32   : > { %1996 = shalt.err (!%p1993_p12)
}
  0x33   : > { %s2795_s3 = sld [smem:[#allocation29_spill]]  ;;  %s2008_s27 = scalar_lea.vmem %s374_s13, 256 }
  0x34   : > { %p2009_p13 = scmp.ne.s32.totalorder %s374_s13, %s2008_s27  ;;  %p2016_p4 = scmp.lt.s32.totalorder %s374_s13, %s374_s13 }
  0x35   : > { %p2017_p9 = scmp.lt.s32.totalorder %s2008_s27, %s2008_s27 }
  0x36   : > { %p2011_p0 = pnand %p2009_p13, %p2444_p7 }
  0x37   : > { %p2018_p8 = por %p2017_p9, %p2016_p4 }
  0x38   : > { %p2012_p2 = pneg %p2011_p0 }
  0x39   : > { %1803 = dma.hbm_to_vmem [thread:$0]  (!%p2438_p6), %s2795_s3, 256, %s350_s30, [#allocation9], %s2778_s16, %s2778_s16, %s2313_s26  }
  0x3a   : > { %p2019_p10 = pnand %p2018_p8, %p2012_p2 }
  0x3c   : > { %2022 = shalt.err (!%p2019_p10)
}
  0x3d   : > { %s2796_s5 = sld [smem:[#allocation31_spill]]  ;;  %s2314_s30 = smov [#allocation14]  }
  0x3e   : > { %s397_s29 = sshll.u32 %s2314_s30, 4  ;;  %s2315_s12 = smov [#allocation7]   ;;  %s398_s29 = int_to_ptr.vmem [resolvable:$true] %s397_s29 }
  0x3f   : > { %s339_s15 = sshll.u32 %s2315_s12, 4  ;;  %s2034_s1 = scalar_lea.vmem %s398_s29, 256  ;;  %s340_s15 = int_to_ptr.vmem [resolvable:$true] %s339_s15 }
  0x40   : > { %p2035_p11 = scmp.ne.s32.totalorder %s398_s29, %s2034_s1  ;;  %p2042_p0 = scmp.lt.s32.totalorder %s398_s29, %s398_s29 }
  0x41   : > { %p2043_p2 = scmp.lt.s32.totalorder %s2034_s1, %s2034_s1 }
  0x42   : > { %p2037_p12 = pnand %p2035_p11, %p2444_p7 }
  0x43   : > { %1809 = dma.hbm_to_vmem [thread:$0]  (!%p2438_p6), %s2796_s5, 256, %s374_s13, [#allocation12], %s2778_s16, %s2778_s16, %s2313_s26  }
  0x44   : > { %p2038_p13 = pneg %p2037_p12  ;;  %p2044_p4 = por %p2043_p2, %p2042_p0 }
  0x46   : > { %p2045_p9 = pnand %p2044_p4, %p2038_p13 }
  0x48   : > { %2048 = shalt.err (!%p2045_p9)
}
  0x49   : > { %s2797_s7 = sld [smem:[#allocation33_spill]]  ;;  %s2060_s23 = scalar_lea.vmem %s340_s15, 16 }
  0x4a   : > { %p2061_p8 = scmp.ne.s32.totalorder %s340_s15, %s2060_s23  ;;  %s2067_s1 = scalar_lea.vmem %s340_s15, 32 }
  0x4b   : > { %p2068_p12 = scmp.lt.s32.totalorder %s340_s15, %s340_s15  ;;  %p2069_p13 = scmp.lt.s32.totalorder %s2067_s1, %s2060_s23 }
  0x4c   : > { %p2063_p10 = pnand %p2061_p8, %p2444_p7 }
  0x4d   : > { %p2070_p0 = por %p2069_p13, %p2068_p12 }
  0x4e   : > { %p2064_p11 = pneg %p2063_p10 }
  0x4f   : > { %1815 = dma.hbm_to_vmem [thread:$0]  (!%p2438_p6), %s2797_s7, 256, %s398_s29, [#allocation15], %s2778_s16, %s2778_s16, %s2313_s26  }
  0x50   : > { %p2071_p2 = pnand %p2070_p0, %p2064_p11 }
  0x52   : > { %2074 = shalt.err (!%p2071_p2)
}
  0x53   : > { %s2798_s2 = sld [smem:[#allocation28_spill]]  ;;  %s2316_s29 = smov [#allocation10]  }
  0x54   : > { %s363_s12 = sshll.u32 %s2316_s29, 4  ;;  %s2317_s13 = smov [#allocation13]   ;;  %s364_s12 = int_to_ptr.vmem [resolvable:$true] %s363_s12 }
  0x55   : > { %s387_s27 = sshll.u32 %s2317_s13, 4  ;;  %s2086_s16 = scalar_lea.vmem %s364_s12, 16  ;;  %s388_s27 = int_to_ptr.vmem [resolvable:$true] %s387_s27 }
  0x56   : > { %p2087_p4 = scmp.ne.s32.totalorder %s364_s12, %s2086_s16  ;;  %s2093_s23 = scalar_lea.vmem %s364_s12, 32 }
  0x57   : > { %p2094_p10 = scmp.lt.s32.totalorder %s364_s12, %s364_s12  ;;  %p2095_p11 = scmp.lt.s32.totalorder %s2093_s23, %s2086_s16 }
  0x58   : > { %p2089_p9 = pnand %p2087_p4, %p2444_p7 }
  0x59   : > { %1800 = dma.hbm_to_vmem [thread:$0]  (!%p2438_p6), %s2798_s2, 16, %s340_s15, [#allocation6]  }
  0x5a   : > { %p2090_p8 = pneg %p2089_p9  ;;  %p2096_p12 = por %p2095_p11, %p2094_p10 }
  0x5c   : > { %p2097_p13 = pnand %p2096_p12, %p2090_p8 }
  0x5e   : > { %2100 = shalt.err (!%p2097_p13)
}
  0x5f   : > { %s2799_s4 = sld [smem:[#allocation30_spill]]  ;;  %s2112_s11 = scalar_lea.vmem %s388_s27, 16 }
  0x60   : > { %p2113_p0 = scmp.ne.s32.totalorder %s388_s27, %s2112_s11  ;;  %s2119_s30 = scalar_lea.vmem %s388_s27, 32 }
  0x61   : > { %p2120_p9 = scmp.lt.s32.totalorder %s388_s27, %s388_s27  ;;  %p2121_p5 = scmp.lt.s32.totalorder %s2119_s30, %s2112_s11 }
  0x62   : > { %p2115_p2 = pnand %p2113_p0, %p2444_p7 }
  0x63   : > { %p2122_p3 = por %p2121_p5, %p2120_p9 }
  0x64   : > { %p2116_p4 = pneg %p2115_p2 }
  0x65   : > { %1806 = dma.hbm_to_vmem [thread:$0]  (!%p2438_p6), %s2799_s4, 16, %s364_s12, [#allocation9]  }
  0x66   : > { %p2123_p10 = pnand %p2122_p3, %p2116_p4 }
  0x68   : > { %2126 = shalt.err (!%p2123_p10)
}
  0x69   : > { %s2800_s6 = sld [smem:[#allocation32_spill]]  ;;  %s2318_s12 = smov [#allocation16]  }
  0x6a   : > { %s411_s13 = sshll.u32 %s2318_s12, 4  ;;  %s2319_s23 = smov [#allocation17]   ;;  %s412_s13 = int_to_ptr.vmem [resolvable:$true] %s411_s13 }
  0x6b   : > { %s424_s1 = sshll.u32 %s2319_s23, 4  ;;  %s2138_s15 = scalar_lea.vmem %s412_s13, 16  ;;  %s425_s1 = int_to_ptr.vmem [resolvable:$true] %s424_s1 }
  0x6c   : > { %p2139_p8 = scmp.ne.s32.totalorder %s412_s13, %s2138_s15  ;;  %s2145_s11 = scalar_lea.vmem %s412_s13, 32 }
  0x6d   : > { %p2146_p3 = scmp.lt.s32.totalorder %s412_s13, %s412_s13  ;;  %p2147_p5 = scmp.lt.s32.totalorder %s2145_s11, %s2138_s15 }
  0x6e   : > { %p2141_p11 = pnand %p2139_p8, %p2444_p7 }
  0x6f   : > { %1812 = dma.hbm_to_vmem [thread:$0]  (!%p2438_p6), %s2800_s6, 16, %s388_s27, [#allocation12]  }
  0x70   : > { %p2142_p12 = pneg %p2141_p11  ;;  %p2148_p13 = por %p2147_p5, %p2146_p3 }
  0x72   : > { %p2149_p0 = pnand %p2148_p13, %p2142_p12 }
  0x74   : > { %2152 = shalt.err (!%p2149_p0)
}
  0x75   : > { %1818 = dma.hbm_to_vmem [thread:$0]  (!%p2438_p6), %s2772_s8, 16, %s412_s13, [#allocation15]  }
  0x76   : > { %s2164_s16 = scalar_lea.vmem %s425_s1, 256  ;;  %p2172_p10 = scmp.lt.s32.totalorder %s425_s1, %s425_s1 }
  0x77   : > { %p2165_p2 = scmp.ne.s32.totalorder %s425_s1, %s2164_s16  ;;  %p2173_p8 = scmp.lt.s32.totalorder %s2164_s16, %s2164_s16 }
  0x79   : > { %p2167_p4 = pnand %p2165_p2, %p2444_p7  ;;  %p2174_p11 = por %p2173_p8, %p2172_p10 }
  0x7b   : > { %p2168_p9 = pneg %p2167_p4 }
  0x7d   : > { %p2175_p1 = pnand %p2174_p11, %p2168_p9 }
  0x7f   : > { %2178 = shalt.err (!%p2175_p1)
}
  0x80   : > { %s2801_s29 = smov 64   ;;  %s1564_s28 = sadd.s32 4294967294, %s2307_s22  }
  0x81   : > { %1821 = dma.hbm_to_vmem [thread:$0]  (!%p2438_p6), %s2774_s10, 256, %s425_s1, [#allocation18], %s2801_s29, %s2801_s29, %s2313_s26  }
  0x82   : > { %s44_s14 = sadd.s32 1, %s2303_s21  ;;  %s51_s13 = sadd.s32 1, %s2295_s19 }
  0x83   : > { %p46_p1 = scmp.ge.s32.totalorder %s44_s14, 2  ;;  %p58_p7 = scmp.ne.s32.totalorder %s2295_s19, %s2291_s18 }
  0x84   : > { %p59_p12 = scmp.eq.s32.totalorder %s2307_s22, 0  ;;  %p64_p3 = scmp.ne.s32.totalorder %s2291_s18, %s2287_s17 }
  0x85   : > { %s2819_s14 = smov (%p46_p1, %s44_s14), 0  ;;  %p2803_p13 = scmp.ne.s32.totalorder %s2790_s24, 0 }
  0x86   : > { %p2536_p5 = por %p59_p12, %p58_p7  ;;  %s48_s1 = ssub.s32 %s2303_s21, %s2819_s14 }
  0x87   : > { %p2542_p6 = por %p2803_p13, %p64_p3  ;;  %s2805_s11 = sadd.s32 4294967295, %s2307_s22  }
  0x88   : > { %p300_p0 = scmp.eq.s32.totalorder %s2805_s11, 1  ;;  %p49_p2 = scmp.eq.s32.totalorder %s48_s1, 0 }
  0x89   : > { %p306_p4 = scmp.eq.s32.totalorder %s1564_s28, 1  ;;  %p1839_p10 = scmp.lt.s32.totalorder %s2307_s22, 2 }
  0x8a   : > { %p2550_p9 = por %p300_p0, %p58_p7  ;;  %s438_s29 = sand.u32 1, %s2295_s19  }
  0x8b   : > { %s2556_s27 = scalar_select %p49_p2, %s2295_s19, %s51_s13  }
  0x8c   : > { %p2558_p8 = por %p306_p4, %p64_p3  ;;  %s1576_s12 = sshll.u32 %s438_s29, 3 }
  0x8d   : > { %s1577_s23 = sshll.u32 %s2303_s21, 7  ;;  %s442_s1 = scalar_lea.vmem [#allocation2], %s1576_s12 }
  0x8e   : > { %s447_s11 = scalar_lea.hbm %s2764_s0, %s1577_s23  ;;  %s449_s28 = sshll.u32 %s442_s1, 4  ;;  %s450_s28 = int_to_ptr.vmem [resolvable:$true] %s449_s28 }
  0x8f   : > { %p2569_p11 = pnand %p1839_p10, %p2536_p5  ;;  %s439_s13 = scalar_lea.sflag [#allocation3], %s438_s29 }
  0x90   : > { %s2192_s5 = scalar_lea.vmem %s450_s28, 128  ;;  %s2320_s6 = smov [#allocation2]  }
  0x91   : > { %p2181_p1 = pneg %p2569_p11  ;;  %p2193_p7 = scmp.ne.s32.totalorder %s450_s28, %s2192_s5 }
  0x92   : > { %s2197_s7 = sshll.u32 %s2320_s6, 4  ;;  %s2198_s7 = int_to_ptr.vmem [resolvable:$false] %s2197_s7 }
  0x93   : > { %p2195_p12 = pnand %p2193_p7, %p2181_p1  ;;  %s2199_s2 = scalar_lea.vmem %s2198_s7, 256 }
  0x94   : > { %p2200_p13 = scmp.lt.s32.totalorder %s450_s28, %s2198_s7  ;;  %p2201_p0 = scmp.lt.s32.totalorder %s2199_s2, %s2192_s5 }
  0x95   : > { %p2196_p3 = pneg %p2195_p12 }
  0x96   : > { %p2202_p2 = por %p2201_p0, %p2200_p13 }
  0x98   : > { %p2203_p4 = pnand %p2202_p2, %p2196_p3 }
  0x9a   : > { %2206 = shalt.err (!%p2203_p4)
}
  0x9b   : > { %1825 = dma.hbm_to_vmem [thread:$0]  (!%p2569_p11), %s447_s11, 128, %s450_s28, %s439_s13  }
  0x9c   : > { %p2809_p5 = scmp.ne.s32.totalorder %s2791_s25, 0 }
  0x9d   : > { %s2580_s3 = sand.u32 (!%p2809_p5), 1, %s2291_s18  }
  0x9e   : > { %458 = sbr.rel (%p2809_p5) target bundleno = 1942 (0x796), region = 64  ;;  %s1579_s6 = sshll.u32 (!%p2809_p5), %s2580_s3, 3 }
  0x9f   : > { %s461_s15 = scalar_lea.sflag (!%p2809_p5), [#allocation3], %s2580_s3  ;;  %s464_s5 = scalar_lea.vmem (!%p2809_p5), [#allocation2], %s1579_s6 }
  0xa3   : > { %2258 = dma.done.wait (%p2542_p6), %s461_s15, 128  }
  0xa4   : > { %2260 = vsyncadd (%p2542_p6), %s461_s15, 4294967168  ;;  %p2810_p10 = scmp.ne.s32.totalorder %s2790_s24, 0 }
  0xa6   : > { %2262 = dma.done.wait (%p2810_p10), [#allocation6], 272  }
  0xa7   : > { %2264 = vsyncadd (%p2810_p10), [#allocation6], 4294967024 }
  0xa8   : > { %2266 = dma.done.wait (%p2810_p10), [#allocation9], 272  }
  0xa9   : > { %2268 = vsyncadd (%p2810_p10), [#allocation9], 4294967024 }
  0xaa   : > { %2270 = dma.done.wait (%p2810_p10), [#allocation12], 272  }
  0xab   : > { %2272 = vsyncadd (%p2810_p10), [#allocation12], 4294967024 }
  0xac   : > { %2274 = dma.done.wait (%p2810_p10), [#allocation15], 272  }
  0xad   : > { %2276 = vsyncadd (%p2810_p10), [#allocation15], 4294967024 }
  0xae   : > { %2278 = dma.done.wait (%p2810_p10), [#allocation18], 256  }
  0xaf   : > { %2280 = vsyncadd (%p2810_p10), [#allocation18], 4294967040  ;;  %v2321_v0 = vmov 0.0   ;;  %vm2322_vm0 = vmmov 0   ;;  %v1917_v1 = vld [vmem:[#allocation8 + $0x8] sm:$0xff]   ;;  %v1918_v2 = vld [vmem:[#allocation5 + $0x8] sm:$0xff]  }
  0xb0   : > { %1666 = vmatprep.subr.bf16.mxu1 %v2321_v0  ;;  %1658 = vmatprep.subr.bf16.mxu0 %v2321_v0  ;;  %v1919_v3 = vld [vmem:[#allocation8] sm:$0xff]   ;;  %v1920_v4 = vld [vmem:[#allocation5] sm:$0xff]   ;;  %vm565_vm1 = vcmask 261120   ;;  %v1590_v8 = vld [vmem:[#allocation7] ss:$0 sm:$0xff]  ;;  %vm738_vm2 = vcmask 64512  }
  0xb1   : > { %1670 = vmatprep.mubr.msk.bf16.mxu1 %vm2322_vm0, %v2321_v0  ;;  %1662 = vmatprep.mubr.msk.bf16.mxu0 %vm2322_vm0, %v2321_v0  ;;  %v2618_v5 = vld [vmem:[%s464_s5] sm:$0xff]  ;;  %v1594_v7 = vld [vmem:[#allocation10] ss:$0 sm:$0xff]  ;;  %s2323_s4 = smov 112   ;;  %s2324_s7 = smov 120   ;;  %v1922_v23 = vld [vmem:[#allocation11] sm:$0xff]  }
  0xb2   : > { %1667 = vmatpush3.bf16.msra.mxu1 %v1917_v1  ;;  %1659 = vmatpush3.bf16.msra.mxu0 %v1918_v2  ;;  %v541_v6 = vpack.c.bf16 %v2618_v5, %v2618_v5  ;;  %s2325_s24 = smov 104   ;;  %v1921_v22 = vld [vmem:[#allocation11 + $0x8] sm:$0xff]   ;;  %v1598_v38 = vld [vmem:[#allocation13] ss:$0 sm:$0xff]  ;;  %vm800_vm3 = vcmask 1043456   ;;  %s2326_s25 = smov 8  }
  0xb3   : > { %1668 = vmatprep.subr.bf16.mxu1 %v2321_v0  ;;  %1660 = vmatprep.subr.bf16.mxu0 %v2321_v0  ;;  %s2327_s26 = smov 16   ;;  %s2328_s29 = smov 24   ;;  %vm1190_vm4 = vcmask 130048   ;;  %vm1192_vm5 = vcmask 195584  }
  0xb4   : > { %s1621_s28 = sshll.u32 %s2299_s20, 7  ;;  %s538_s13 = scalar_lea.vmem [#allocation19], %s1579_s6 }
  0xb5   : > { %s1398_s2 = sshll.u32 %s538_s13, 4  ;;  %s1384_s20 = scalar_lea.sflag [#allocation4], %s2580_s3  ;;  %s2717_s2 = int_to_ptr.vmem [resolvable:$true] %s1398_s2 }
  0xb6   : > { %1669 = vmatpush3.bf16.msra.mxu1 %v1919_v3  ;;  %1661 = vmatpush3.bf16.msra.mxu0 %v1920_v4  ;;  %s2329_s6 = smov [#allocation19]  }
  0xb7   : > { %1682 = vmatprep.subr.bf16.mxu1 %v2321_v0  ;;  %1674 = vmatprep.subr.bf16.mxu0 %v2321_v0 }
  0xb9   : > { %1671 = vmatmul.mubr.msk.bf16.vlgmr.msra.gmra.mxu1 %vm565_vm1, %v541_v6  ;;  %1663 = vmatmul.mubr.msk.bf16.vlgmr.msra.gmra.mxu0 %vm565_vm1, %v541_v6 }
  0xba   : > { %1684 = vmatprep.mubr.msk.bf16.mxu1 %vm2322_vm0, %v2321_v0  ;;  %1678 = vmatprep.mubr.msk.bf16.mxu0 %vm2322_vm0, %v2321_v0 }
  0xbb   : > { %1675 = vmatpush3.bf16.msra.mxu0 %v1921_v22 }
  0xbc   : > { %1676 = vmatprep.subr.bf16.mxu0 %v2321_v0 }
  0xbf   : > { %1677 = vmatpush3.bf16.msra.mxu0 %v1922_v23 }
  0xc0   : > { %1688 = vmatprep.subr.bf16.mxu0 %v2321_v0 }
  0xc2   : > { %1679 = vmatmul.mubr.msk.bf16.vlgmr.msra.gmra.mxu0 %vm565_vm1, %v541_v6 }
  0xc3   : > { %1690 = vmatprep.mubr.msk.bf16.mxu0 %vm2322_vm0, %v2321_v0 }
 0x179   : > { %v666_v9 = vpop.f32.mrf.mxu1  ;;  %v603_v11 = vpop.f32.mrf.mxu0 }
 0x17a   : > { %v667_v10 = vadd.f32 %v1594_v7, %v666_v9  ;;  %v604_v12 = vadd.f32 %v1590_v8, %v603_v11 }
 0x17b   : > { %v1672_v13 = vpop.f32.mrf.mxu1  ;;  %v1664_v15 = vpop.f32.mrf.mxu0 }
 0x17c   : > { %v736_v14 = vpack.c.bf16 %v667_v10, %v667_v10  ;;  %v735_v17 = vpack.c.bf16 %v604_v12, %v604_v12 }
 0x17d   : > { %v669_v16 = vpop.f32.mrf.mxu1  ;;  %v606_v18 = vpop.f32.mrf.mxu0 }
 0x17e   : > { %959 = vrot.lane.b32.xlu1 %v736_v14, %s2323_s4  ;;  %848 = vrot.lane.b32.xlu0 %v736_v14, %s2324_s7  ;;  %v743_v19 = vsel %vm738_vm2, %v736_v14, 0 }
 0x17f   : > { %v1673_v20 = vpop.f32.mrf.mxu1  ;;  %1683 = vmatpush3.bf16.xpose.msra.mxu1 %v743_v19  ;;  %v1665_v21 = vpop.f32.mrf.mxu0 }
 0x180   : > { %1694 = vmatprep.subr.bf16.mxu1 %v2321_v0 }
 0x182   : > { %957 = vrot.lane.b32.xlu1 %v735_v17, %s2323_s4  ;;  %845 = vrot.lane.b32.xlu0 %v735_v17, %s2324_s7  ;;  %v729_v39 = vpop.f32.mrf.mxu0 }
 0x183   : > { %v730_v40 = vadd.f32 %v1598_v38, %v729_v39 }
 0x184   : > { %v1680_v41 = vpop.f32.mrf.mxu0 }
 0x185   : > { %v737_v42 = vpack.c.bf16 %v730_v40, %v730_v40 }
 0x186   : > { %1067 = vrot.lane.b32.xlu1 %v735_v17, %s2325_s24  ;;  %1069 = vrot.lane.b32.xlu0 %v736_v14, %s2325_s24  ;;  %v732_v43 = vpop.f32.mrf.mxu0 }
 0x187   : > { %1685 = vmatmul.mubr.msk.bf16.vlgmr.msra.gmra.mxu1 %vm738_vm2, %v735_v17  ;;  %v802_v44 = vsel %vm800_vm3, %v737_v42, 0 }
 0x188   : > { %1696 = vmatprep.mubr.msk.bf16.mxu1 %vm2322_vm0, %v2321_v0  ;;  %v1681_v45 = vpop.f32.mrf.mxu0  ;;  %1689 = vmatpush3.bf16.msra.mxu0 %v802_v44 }
 0x189   : > { %1700 = vmatprep.subr.bf16.mxu0 %v2321_v0  ;;  %v1923_v45 = vld [vmem:[#allocation14 + $0x8] sm:$0xff]  }
 0x1f0   : > { %v849_v24 = vpop.permute.xlu0 %848  ;;  %v960_v26 = vpop.permute.xlu1 %959 }
 0x1f1   : > { %v854_v25 = vsel %vm738_vm2, %v849_v24, 0  ;;  %v965_v28 = vsel %vm738_vm2, %v960_v26, 0 }
 0x1f2   : > { %1695 = vmatpush3.bf16.xpose.msra.mxu1 %v854_v25 }
 0x1f3   : > { %1706 = vmatprep.subr.bf16.mxu1 %v2321_v0 }
 0x1f4   : > { %v846_v27 = vpop.permute.xlu0 %845  ;;  %v958_v30 = vpop.permute.xlu1 %957 }
 0x1f8   : > { %v1070_v29 = vpop.permute.xlu0 %1069  ;;  %v1068_v32 = vpop.permute.xlu1 %1067 }
 0x1f9   : > { %1697 = vmatmul.mubr.msk.bf16.vlgmr.msra.gmra.mxu1 %vm738_vm2, %v846_v27  ;;  %v1075_v31 = vsel %vm738_vm2, %v1070_v29, 0 }
 0x1fa   : > { %1707 = vmatpush3.bf16.xpose.msra.mxu1 %v965_v28  ;;  %1708 = vmatprep.mubr.msk.bf16.mxu1 %vm2322_vm0, %v2321_v0 }
 0x1fb   : > { %1718 = vmatprep.subr.bf16.mxu1 %v2321_v0 }
 0x201   : > { %1709 = vmatmul.mubr.msk.bf16.vlgmr.msra.gmra.mxu1 %vm738_vm2, %v958_v30 }
 0x202   : > { %1719 = vmatpush3.bf16.xpose.msra.mxu1 %v1075_v31  ;;  %1720 = vmatprep.mubr.msk.bf16.mxu1 %vm2322_vm0, %v2321_v0 }
 0x203   : > { %1730 = vmatprep.subr.bf16.mxu1 %v2321_v0 }
 0x209   : > { %1721 = vmatmul.mubr.msk.bf16.vlgmr.msra.gmra.mxu1 %vm738_vm2, %v1068_v32 }
 0x20a   : > { %1734 = vmatprep.mubr.msk.bf16.mxu1 %vm2322_vm0, %v2321_v0  ;;  %1731 = vmatpush3.bf16.msra.mxu1 %v1923_v45 }
 0x20b   : > { %1732 = vmatprep.subr.bf16.mxu1 %v2321_v0 }
 0x247   : > { %v779_v33 = vpop.f32.mrf.mxu1 }
 0x248   : > { %v785_v34 = vsel %vm738_vm2, %v779_v33, -inf }
 0x249   : > { %786 = vmax.xlane.f32.xlu0 %v785_v34  ;;  %v1686_v35 = vpop.f32.mrf.mxu1 }
 0x24b   : > { %v782_v36 = vpop.f32.mrf.mxu1 }
 0x24d   : > { %v1687_v37 = vpop.f32.mrf.mxu1 }
 0x2b9   : > { %v890_v46 = vpop.f32.mrf.mxu1 }
 0x2ba   : > { %v896_v47 = vsel %vm738_vm2, %v890_v46, -inf }
 0x2bb   : > { %897 = vmax.xlane.f32.xlu1 %v896_v47  ;;  %v1698_v48 = vpop.f32.mrf.mxu1 }
 0x2bc   : > { %v1924_v48 = vld [vmem:[#allocation14] sm:$0xff]  }
 0x2bd   : > { %v893_v49 = vpop.f32.mrf.mxu1  ;;  %1733 = vmatpush3.bf16.msra.mxu1 %v1924_v48 }
 0x2be   : > { %1746 = vmatprep.subr.bf16.mxu1 %v2321_v0 }
 0x2bf   : > { %v1699_v50 = vpop.f32.mrf.mxu1 }
 0x2c1   : > { %v1001_v51 = vpop.f32.mrf.mxu1 }
 0x2c2   : > { %v1007_v52 = vsel %vm738_vm2, %v1001_v51, -inf }
 0x2c3   : > { %1008 = vmax.xlane.f32.xlu0 %v1007_v52  ;;  %v1710_v53 = vpop.f32.mrf.mxu1 }
 0x2c5   : > { %v1004_v54 = vpop.f32.mrf.mxu1 }
 0x2c7   : > { %v1711_v55 = vpop.f32.mrf.mxu1 }
 0x2c9   : > { %v1111_v56 = vpop.f32.mrf.mxu1 }
 0x2ca   : > { %v1117_v57 = vsel %vm738_vm2, %v1111_v56, -inf }
 0x2cb   : > { %1118 = vmax.xlane.f32.xlu0 %v1117_v57  ;;  %v1722_v58 = vpop.f32.mrf.mxu1 }
 0x2cd   : > { %v1114_v59 = vpop.f32.mrf.mxu1 }
 0x2cf   : > { %v1723_v60 = vpop.f32.mrf.mxu1 }
 0x2d2   : > { %v787_v61 = vpop.xlane.xlu0 %786 }
 0x2d3   : > { %v788_v62 = vsub.f32 %v779_v33, %v787_v61 }
 0x2d5   : > { %v789_v63 = vmul.f32 1.442695, %v788_v62 }
 0x2d7   : > { %1929 = vpow2.f32 %v789_v63 }
 0x2e4   : > { %v1930_v1 = vpop.eup %1929 }
 0x2e5   : > { %v791_v2 = vsel %vm738_vm2, %v1930_v1, 0.0 }
 0x2e6   : > { %792 = vadd.xlane.f32.xlu1 %v791_v2 }
 0x2f7   : > { %909 = vrot.lane.b32.xlu1 %v737_v42, %s2324_s7 }
 0x344   : > { %v898_v3 = vpop.xlane.xlu1 %897 }
 0x345   : > { %v899_v4 = vsub.f32 %v890_v46, %v898_v3  ;;  %v1925_v3 = vld [vmem:[%s2773_s9 + $0x8] sm:$0xff]  }
 0x347   : > { %v900_v6 = vmul.f32 1.442695, %v899_v4  ;;  %v1926_v4 = vld [vmem:[%s2773_s9] sm:$0xff]  }
 0x349   : > { %1931 = vpow2.f32 %v900_v6  ;;  %v1927_v6 = vld [vmem:[#allocation17 + $0x8] sm:$0xff]  }
 0x34c   : > { %v1009_v7 = vpop.xlane.xlu0 %1008 }
 0x34d   : > { %v1010_v8 = vsub.f32 %v1001_v51, %v1009_v7  ;;  %v1610_v7 = vld [vmem:[#allocation16] ss:$0 sm:$0xff] }
 0x34f   : > { %v1011_v9 = vmul.f32 1.442695, %v1010_v8 }
 0x351   : > { %1933 = vpow2.f32 %v1011_v9 }
 0x354   : > { %v1119_v10 = vpop.xlane.xlu0 %1118 }
 0x355   : > { %v1120_v11 = vsub.f32 %v1111_v56, %v1119_v10 }
 0x356   : > { %v1932_v12 = vpop.eup %1931 }
 0x357   : > { %v1121_v13 = vmul.f32 1.442695, %v1120_v11  ;;  %v902_v14 = vsel %vm738_vm2, %v1932_v12, 0.0 }
 0x358   : > { %903 = vadd.xlane.f32.xlu0 %v902_v14 }
 0x359   : > { %1935 = vpow2.f32 %v1121_v13 }
 0x35e   : > { %v1934_v15 = vpop.eup %1933 }
 0x35f   : > { %v1013_v16 = vsel %vm738_vm2, %v1934_v15, 0.0 }
 0x360   : > { %1014 = vadd.xlane.f32.xlu1 %v1013_v16 }
 0x366   : > { %v1936_v17 = vpop.eup %1935 }
 0x367   : > { %v1123_v18 = vsel %vm738_vm2, %v1936_v17, 0.0 }
 0x368   : > { %1124 = vadd.xlane.f32.xlu0 %v1123_v18 }
 0x36f   : > { %v793_v19 = vpop.xlane.xlu1 %792 }
 0x370   : > { %1937 = vrcp.f32 %v793_v19 }
 0x371   : > { %1129 = vrot.lane.b32.xlu1 %v737_v42, %s2325_s24  ;;  %s2207_s24 = scalar_lea.vmem %s2717_s2, 128 }
 0x372   : > { %p2208_p6 = scmp.ne.s32.totalorder %s2717_s2, %s2207_s24 }
 0x373   : > { %v910_v21 = vpop.permute.xlu1 %909 }
 0x374   : > { %v915_v24 = vsel %vm800_vm3, %v910_v21, 0  ;;  %p2209_p11 = pnand %p2208_p6, %p2550_p9 }
 0x376   : > { %p2210_p1 = pneg %p2209_p11 }
 0x37d   : > { %v1938_v20 = vpop.eup %1937 }
 0x37e   : > { %1019 = vrot.lane.b32.xlu0 %v737_v42, %s2323_s4  ;;  %v795_v22 = vmul.f32 %v1938_v20, %v1930_v1  ;;  %s2811_s4 = sld [smem:[#allocation34_spill]] }
 0x380   : > { %v796_v23 = vpack.c.bf16 %v795_v22, %v795_v22 }
 0x382   : > { %1691 = vmatmul.mubr.msk.bf16.vlgmr.msra.gmra.mxu0 %vm738_vm2, %v796_v23 }
 0x383   : > { %1701 = vmatpush3.bf16.msra.mxu0 %v915_v24  ;;  %1702 = vmatprep.mubr.msk.bf16.mxu0 %vm2322_vm0, %v2321_v0 }
 0x384   : > { %1712 = vmatprep.subr.bf16.mxu0 %v2321_v0  ;;  %s2715_s7 = scalar_lea.hbm %s2811_s4, %s1621_s28 }
 0x3e1   : > { %v904_v25 = vpop.xlane.xlu0 %903 }
 0x3e2   : > { %1939 = vrcp.f32 %v904_v25 }
 0x3e9   : > { %v1015_v26 = vpop.xlane.xlu1 %1014 }
 0x3ea   : > { %1941 = vrcp.f32 %v1015_v26 }
 0x3ed   : > { %v1130_v35 = vpop.permute.xlu1 %1129 }
 0x3ee   : > { %v1135_v37 = vsel %vm800_vm3, %v1130_v35, 0 }
 0x3ef   : > { %v1940_v27 = vpop.eup %1939 }
 0x3f0   : > { %v906_v28 = vmul.f32 %v1940_v27, %v1932_v12 }
 0x3f1   : > { %v1125_v29 = vpop.xlane.xlu0 %1124 }
 0x3f2   : > { %1943 = vrcp.f32 %v1125_v29  ;;  %v907_v30 = vpack.c.bf16 %v906_v28, %v906_v28 }
 0x3f4   : > { %1703 = vmatmul.mubr.msk.bf16.vlgmr.msra.gmra.mxu0 %vm738_vm2, %v907_v30 }
 0x3f5   : > { %v1020_v31 = vpop.permute.xlu0 %1019  ;;  %1714 = vmatprep.mubr.msk.bf16.mxu0 %vm2322_vm0, %v2321_v0 }
 0x3f6   : > { %v1025_v32 = vsel %vm800_vm3, %v1020_v31, 0 }
 0x3f7   : > { %v1942_v33 = vpop.eup %1941  ;;  %1713 = vmatpush3.bf16.msra.mxu0 %v1025_v32 }
 0x3f8   : > { %1724 = vmatprep.subr.bf16.mxu0 %v2321_v0  ;;  %v1017_v34 = vmul.f32 %v1942_v33, %v1934_v15  ;;  %v1928_v15 = vld [vmem:[#allocation17] sm:$0xff]  }
 0x3fa   : > { %v1018_v36 = vpack.c.bf16 %v1017_v34, %v1017_v34 }
 0x3fc   : > { %1715 = vmatmul.mubr.msk.bf16.vlgmr.msra.gmra.mxu0 %vm738_vm2, %v1018_v36 }
 0x3fd   : > { %1725 = vmatpush3.bf16.msra.mxu0 %v1135_v37  ;;  %1726 = vmatprep.mubr.msk.bf16.mxu0 %vm2322_vm0, %v2321_v0 }
 0x3fe   : > { %1738 = vmatprep.subr.bf16.mxu0 %v2321_v0 }
 0x3ff   : > { %v1944_v38 = vpop.eup %1943 }
 0x400   : > { %v1127_v39 = vmul.f32 %v1944_v38, %v1936_v17 }
 0x402   : > { %v1128_v40 = vpack.c.bf16 %v1127_v39, %v1127_v39 }
 0x404   : > { %1727 = vmatmul.mubr.msk.bf16.vlgmr.msra.gmra.mxu0 %vm738_vm2, %v1128_v40 }
 0x405   : > { %1742 = vmatprep.mubr.msk.bf16.mxu0 %vm2322_vm0, %v2321_v0  ;;  %1739 = vmatpush3.bf16.msra.mxu0 %v1925_v3 }
 0x406   : > { %1740 = vmatprep.subr.bf16.mxu0 %v2321_v0 }
 0x409   : > { %1741 = vmatpush3.bf16.msra.mxu0 %v1926_v4 }
 0x442   : > { %v838_v41 = vpop.f32.mrf.mxu0 }
 0x444   : > { %v1692_v42 = vpop.f32.mrf.mxu0 }
 0x446   : > { %v841_v43 = vpop.f32.mrf.mxu0 }
 0x448   : > { %v1693_v44 = vpop.f32.mrf.mxu0 }
 0x4b4   : > { %v951_v46 = vpop.f32.mrf.mxu0 }
 0x4b5   : > { %1178 = vrot.lane.b32.xlu1 %v951_v46, %s2326_s25  ;;  %s2211_s25 = sshll.u32 %s2329_s6, 4  ;;  %s2212_s25 = int_to_ptr.vmem [resolvable:$false] %s2211_s25 }
 0x4b6   : > { %v1704_v47 = vpop.f32.mrf.mxu0  ;;  %p2214_p7 = scmp.lt.s32.totalorder %s2717_s2, %s2212_s25 }
 0x4b8   : > { %v954_v49 = vpop.f32.mrf.mxu0 }
 0x4ba   : > { %v1705_v50 = vpop.f32.mrf.mxu0 }
 0x4bc   : > { %v1061_v51 = vpop.f32.mrf.mxu0 }
 0x4bd   : > { %1182 = vrot.lane.b32.xlu0 %v1061_v51, %s2327_s26  ;;  %s2213_s26 = scalar_lea.vmem %s2212_s25, 256 }
 0x4be   : > { %v1716_v52 = vpop.f32.mrf.mxu0  ;;  %p2215_p12 = scmp.lt.s32.totalorder %s2213_s26, %s2207_s24 }
 0x4c0   : > { %v1064_v53 = vpop.f32.mrf.mxu0  ;;  %p2216_p3 = por %p2215_p12, %p2214_p7 }
 0x4c2   : > { %v1717_v54 = vpop.f32.mrf.mxu0  ;;  %p2217_p13 = pnand %p2216_p3, %p2210_p1 }
 0x4c4   : > { %v1171_v55 = vpop.f32.mrf.mxu0 }
 0x4c5   : > { %1186 = vrot.lane.b32.xlu1 %v1171_v55, %s2328_s29 }
 0x4c6   : > { %v1728_v56 = vpop.f32.mrf.mxu0 }
 0x4c8   : > { %v1174_v57 = vpop.f32.mrf.mxu0 }
 0x4ca   : > { %v1729_v58 = vpop.f32.mrf.mxu0 }
 0x527   : > { %v1179_v59 = vpop.permute.xlu1 %1178 }
 0x528   : > { %v1189_v61 = vsel %vm738_vm2, %v838_v41, %v1179_v59 }
 0x52f   : > { %v1183_v60 = vpop.permute.xlu0 %1182 }
 0x530   : > { %v1191_v62 = vsel %vm1190_vm4, %v1189_v61, %v1183_v60 }
 0x537   : > { %v1187_v63 = vpop.permute.xlu1 %1186 }
 0x538   : > { %v1193_v1 = vsel %vm1192_vm5, %v1191_v62, %v1187_v63 }
 0x539   : > { %v1194_v2 = vpack.c.bf16 %v1193_v1, %v1193_v1 }
 0x53b   : > { %1735 = vmatmul.mubr.msk.bf16.vlgmr.msra.gmra.mxu1 %vm565_vm1, %v1194_v2 }
 0x53c   : > { %1750 = vmatprep.mubr.msk.bf16.mxu1 %vm2322_vm0, %v2321_v0  ;;  %1747 = vmatpush3.bf16.msra.mxu1 %v1927_v6 }
 0x53d   : > { %1748 = vmatprep.subr.bf16.mxu1 %v2321_v0 }
 0x540   : > { %1749 = vmatpush3.bf16.msra.mxu1 %v1928_v15 }
 0x5fb   : > { %v1255_v8 = vpop.f32.mrf.mxu1 }
 0x5fc   : > { %v1256_v9 = vadd.f32 %v1610_v7, %v1255_v8 }
 0x5fd   : > { %v1736_v10 = vpop.f32.mrf.mxu1 }
 0x5fe   : > { %v1261_v11 = vadd.f32 %v1256_v9, %v2618_v5 }
 0x5ff   : > { %v1258_v12 = vpop.f32.mrf.mxu1 }
 0x600   : > { %v1262_v13 = vpack.c.bf16 %v1261_v11, %v1261_v11 }
 0x601   : > { %v1737_v14 = vpop.f32.mrf.mxu1 }
 0x602   : > { %1743 = vmatmul.mubr.msk.bf16.vlgmr.msra.gmra.mxu0 %vm565_vm1, %v1262_v13 }
 0x6c2   : > { %v1316_v16 = vpop.f32.mrf.mxu0 }
 0x6c3   : > { %v1322_v17 = vpack.c.bf16 %v1316_v16, %v1316_v16 }
 0x6c4   : > { %v1744_v18 = vpop.f32.mrf.mxu0 }
 0x6c5   : > { %1751 = vmatmul.mubr.msk.bf16.vlgmr.msra.gmra.mxu1 %vm565_vm1, %v1322_v17 }
 0x6c6   : > { %v1319_v0 = vpop.f32.mrf.mxu0 }
 0x6c8   : > { %v1745_v19 = vpop.f32.mrf.mxu0 }
 0x785   : > { %v1376_v5 = vpop.f32.mrf.mxu1 }
 0x786   : > { %v1377_v20 = vadd.f32 %v1376_v5, %v1261_v11 }
 0x787   : > { %v1752_v21 = vpop.f32.mrf.mxu1 }
 0x788   : > { %1382 = vst.msk [vmem:[%s538_s13] sm:$0xff] %vm565_vm1, %v1377_v20 }
 0x789   : > { %v1379_v22 = vpop.f32.mrf.mxu1 }
 0x78a   : > { %2220 = shalt.err (!%p2217_p13)
}
 0x78b   : > { %s2221_s29 = scalar_lea.hbm %s2715_s7, 128  ;;  %s2225_s23 = scalar_lea.hbm %s2811_s4, 256 }
 0x78c   : > { %p2222_p0 = scmp.ne.s32.totalorder %s2715_s7, %s2221_s29  ;;  %p2226_p5 = scmp.lt.s32.totalorder %s2715_s7, %s2811_s4 }
 0x78d   : > { %p2227_p10 = scmp.lt.s32.totalorder %s2225_s23, %s2221_s29 }
 0x78e   : > { %p2223_p2 = pnand %p2222_p0, %p2550_p9 }
 0x78f   : > { %p2228_p6 = por %p2227_p10, %p2226_p5 }
 0x790   : > { %p2224_p4 = pneg %p2223_p2 }
 0x792   : > { %p2229_p11 = pnand %p2228_p6, %p2224_p4 }
 0x794   : > { %2232 = shalt.err (!%p2229_p11)
}
 0x795   : > { %1792 = dma.vmem_to_hbm [thread:$0]  (%p2550_p9), %s2717_s2, 128, %s2715_s7, %s1384_s20   ;;  %v1753_v23 = vpop.f32.mrf.mxu1 }
 0x796 PF: > { %s1410_s28 = sand.u32 1, %s2287_s17   ;;  %p2812_p1 = scmp.ge.s32.totalorder %s2307_s22, 2 }
 0x797   : > { %s1411_s13 = scalar_lea.sflag [#allocation4], %s1410_s28 }
 0x798   : > { %p1827_p7 = pnand %p2812_p1, %p2558_p8 }
 0x79a   : > { %p1828_p12 = pneg %p1827_p7 }
 0x79c   : > { %2282 = dma.done.wait (%p1828_p12), %s1411_s13, 128  }
 0x79d   : > { %2284 = vsyncadd (%p1828_p12), %s1411_s13, 4294967168  ;;  %s32_s22 = sadd.s32 1, %s2307_s22   ;;  %s2813_s17 = smov %s2291_s18 }
 0x79e   : > { %p29_p3 = scmp.ge.s32.totalorder %s32_s22, 4   ;;  %s2814_s18 = smov %s2295_s19 }
 0x79f   : > { %s2815_s19 = smov %s2556_s27  ;;  %s2816_s20 = smov %s2303_s21 }
 0x7a0   : > { %s2817_s21 = smov %s2819_s14  ;;  %31 = sbr.rel (!%p29_p3) target bundleno = 20 (0x14), region = 145 }
 0x7a5   :  { %1416 = vsyncpa [#allocation3], 1 }
 0x7a6   :  { %1418 = vsyncpa [#allocation3 + $0x1], 1 }
 0x7a7   :  { %1419 = vsyncpa [#allocation6], 1 }
 0x7a8   :  { %1420 = vsyncpa [#allocation9], 1 }
 0x7a9   :  { %1421 = vsyncpa [#allocation12], 1 }
 0x7aa   :  { %1422 = vsyncpa [#allocation15], 1 }
 0x7ab   :  { %1423 = vsyncpa [#allocation18], 1 }
 0x7ac   :  { %1424 = vsyncpa [#allocation4], 1 }
 0x7ad   :  { %1426 = vsyncpa [#allocation4 + $0x1], 1 }

</bundles_post_ra>
